<compile_context>
chip_gen: v5e
topology: v5e:2x2
jax: 0.10.0
libtpu: 0.0.40
codegen_flags: <defaults>
</compile_context>

<pallas_src>
import functools

import numpy as np
import jax
import jax.numpy as jnp
from jax import lax
from jax.experimental import pallas as pl
from jax.experimental.pallas import tpu as pltpu

AUDIO_DIM = 256
IMAGE_DIM = 512
OUT_DIM = 512
ARC_SCALE = 30.0
ARC_MARGIN = 0.2
EPS = 1e-12

_COS_M = float(np.cos(ARC_MARGIN))
_SIN_M = float(np.sin(ARC_MARGIN))
_TH = float(np.cos(np.pi - ARC_MARGIN))
_MM = float(np.sin(np.pi - ARC_MARGIN) * ARC_MARGIN)
_NEG_BIG = -1e30


def _round_up(x, m):
    return ((x + m - 1) // m) * m


# ----------------------------------------------------------------------------
# Pallas kernel: P-tiled ArcFace + online logsumexp + masked-mean cross-entropy
# ----------------------------------------------------------------------------
def arcface_loss_kernel(nvalid_ref,                # (1,) int32 scalar prefetch (SMEM)
                        label_ref,                 # (B, 1) int32
                        emb_ref,                   # (B, 512) bf16, L2-normalized
                        warc_ref,                  # (512, TN) bf16 raw weight tile
                        invn_ref,                  # (1, TN) f32 per-column 1/||w||
                        loss_ref,                  # (1, 1) f32 output
                        m_scr, s_scr, t_scr,       # (B, 1) f32 online-LSE state
                        *, tn, num_people, p_padded):
    j = pl.program_id(0)
    n_tiles = pl.num_programs(0)
    b = label_ref.shape[0]

    @pl.when(j == 0)
    def _init():
        m_scr[...] = jnp.full_like(m_scr, _NEG_BIG)
        s_scr[...] = jnp.zeros_like(s_scr)
        t_scr[...] = jnp.zeros_like(t_scr)

    # cos(theta) for this class tile: bf16 MXU matmul with f32 accumulation,
    # per-column inverse weight norm folded in (weight is streamed raw).
    cos = jnp.dot(emb_ref[...], warc_ref[...],
                  preferred_element_type=jnp.float32) * invn_ref[...]
    cos = jnp.clip(cos, -1.0 + 1e-7, 1.0 - 1e-7)
    sin = jnp.sqrt(1.0 - cos * cos)
    phi = cos * _COS_M - sin * _SIN_M
    phi = jnp.where(cos > _TH, phi, cos - _MM)

    lane = lax.broadcasted_iota(jnp.int32, (b, tn), 1) + j * tn
    is_tgt = lane == label_ref[...]                # (B, TN); no one-hot in HBM
    logits = ARC_SCALE * jnp.where(is_tgt, phi, cos)
    if p_padded != num_people:                     # mask padded class columns
        logits = jnp.where(lane < num_people, logits, _NEG_BIG)

    # online logsumexp + target-logit accumulation
    tile_max = jnp.max(logits, axis=1, keepdims=True)
    m_old = m_scr[...]
    m_new = jnp.maximum(m_old, tile_max)
    alpha = jnp.exp(m_old - m_new)
    p = jnp.exp(logits - m_new)
    s_scr[...] = alpha * s_scr[...] + jnp.sum(p, axis=1, keepdims=True)
    m_scr[...] = m_new
    t_scr[...] = t_scr[...] + jnp.sum(jnp.where(is_tgt, logits, 0.0),
                                      axis=1, keepdims=True)

    # finalize: masked mean cross-entropy
    @pl.when(j == n_tiles - 1)
    def _final():
        lse = m_scr[...] + jnp.log(s_scr[...])     # (B, 1)
        per_row = lse - t_scr[...]
        n_valid = nvalid_ref[0]
        row = lax.broadcasted_iota(jnp.int32, per_row.shape, 0)
        per_row = jnp.where(row < n_valid, per_row, 0.0)
        denom = jnp.maximum(n_valid, 1).astype(jnp.float32)   # guard n_valid==0
        loss_ref[...] = jnp.reshape(jnp.sum(per_row) / denom, (1, 1))


# ----------------------------------------------------------------------------
# Generation-aware tiling / VMEM sizing
# ----------------------------------------------------------------------------
def _tpu_vmem_capacity_bytes():
    try:
        return int(pltpu.get_tpu_info().vmem_capacity_bytes)
    except Exception:
        return 64 * 1024 * 1024        # conservative fallback (fits all gens)


def _choose_tiling(num_people, requested_tn=None):
    vmem_cap = _tpu_vmem_capacity_bytes()
    # v5e/v6e (128 MiB phys) -> 96 MiB; v7x (64 MiB phys) -> 48 MiB.
    vmem_limit = int(min(max(32 * 1024 * 1024, (vmem_cap * 3) // 4),
                         96 * 1024 * 1024))

    if requested_tn is not None:
        tn = int(requested_tn)
    else:
        # Largest class tile whose double-buffered bf16 weight stream fits in
        # ~half the VMEM budget; cap at 8192 so (B, tn) f32 temporaries don't
        # start spilling.
        hw_cap = (vmem_limit // 2) // (OUT_DIM * 2 * 2)
        tn = min(8192, hw_cap)
        # On slow-HBM parts every wasted padded column is real time: shrink the
        # tile (down to 2048) if padding waste would exceed ~3% of the classes.
        if num_people > 2048:
            t = tn
            while t >= 2048:
                waste = _round_up(num_people, t) - num_people
                if waste <= max(128, int(0.03 * num_people)):
                    tn = t
                    break
                t -= 128

    tn = max(128, (tn // 128) * 128)
    tn = min(tn, _round_up(num_people, 128))
    p_padded = _round_up(num_people, tn)
    return tn, p_padded, vmem_limit


def fused_arcface_loss(emb_n_bf16, warc_bf16, inv_norm, labels_idx, n_valid,
                       num_people, tn, p_padded, vmem_limit):
    b_pad = emb_n_bf16.shape[0]
    n_tiles = p_padded // tn

    labels2d = labels_idx.reshape(b_pad, 1).astype(jnp.int32)
    nvalid_arr = jnp.asarray([n_valid], dtype=jnp.int32)

    kernel = functools.partial(arcface_loss_kernel, tn=tn,
                               num_people=num_people, p_padded=p_padded)
    const = lambda j, nv: (0, 0)

    grid_spec = pltpu.PrefetchScalarGridSpec(
        num_scalar_prefetch=1,
        grid=(n_tiles,),
        in_specs=[
            pl.BlockSpec((b_pad, 1), const),                     # labels
            pl.BlockSpec((b_pad, OUT_DIM), const),               # bf16 embedding
            pl.BlockSpec((OUT_DIM, tn), lambda j, nv: (0, j)),   # warc tile (streamed)
            pl.BlockSpec((1, tn), lambda j, nv: (0, j)),         # inv col norm tile
        ],
        out_specs=pl.BlockSpec((1, 1), const),
        scratch_shapes=[
            pltpu.VMEM((b_pad, 1), jnp.float32),   # running max m
            pltpu.VMEM((b_pad, 1), jnp.float32),   # running sum-exp s
            pltpu.VMEM((b_pad, 1), jnp.float32),   # running target logit t
        ],
    )

    out = pl.pallas_call(
        kernel,
        out_shape=jax.ShapeDtypeStruct((1, 1), jnp.float32),
        grid_spec=grid_spec,
        compiler_params=pltpu.CompilerParams(
            dimension_semantics=("arbitrary",),
            vmem_limit_bytes=vmem_limit),
        cost_estimate=pl.CostEstimate(
            flops=2 * b_pad * OUT_DIM * p_padded,
            transcendentals=2 * b_pad * p_padded,
            bytes_accessed=OUT_DIM * p_padded * 2      # bf16 weight stream
            + p_padded * 4                              # inv-norm vector
            + b_pad * (OUT_DIM * 2 + 4) + 4),
    )(nvalid_arr, labels2d, emb_n_bf16, warc_bf16, inv_norm)
    return out[0, 0]


# ----------------------------------------------------------------------------
# Glue: stand-in backbones, fusion (hoisted), check_dummy, parameter init
# ----------------------------------------------------------------------------
def _l2norm_rows(x, eps=EPS):
    # torch.nn.functional.normalize: x / max(||x||_2, eps)
    return x / jnp.maximum(jnp.linalg.norm(x, axis=1, keepdims=True), eps)


def audio_backbone_standin(audio_input, w_audio_backbone):
    # TODO(synk): WavLM_Base_MHFA speaker extractor (external checkpoint) replaced
    # by a deterministic linear stand-in producing a (B, 256) embedding.
    return jnp.dot(audio_input, w_audio_backbone)


def face_backbone_standin(video_input, w_face_backbone):
    # TODO(synk): InceptionResnetV1 (vggface2, NCHW conv stack) replaced by a
    # deterministic per-frame channel-mean + linear stand-in producing (B, T, 512).
    B, T = video_input.shape[0], video_input.shape[1]
    frames = video_input.reshape(-1, 3, 112, 112)        # same view(-1,3,112,112)
    feat = jnp.mean(frames, axis=(2, 3))                 # (B*T, 3)
    return jnp.dot(feat, w_face_backbone).reshape(B, T, IMAGE_DIM)


def check_dummy_np(audio_input, video_input, labels):
    # Faithful host-side re-implementation of check_dummy (data-dependent shapes,
    # so it cannot live inside the kernel). Removes up to 3 all-zero-label rows.
    audio_input = np.asarray(audio_input)
    video_input = np.asarray(video_input)
    labels = np.asarray(labels)
    for _ in range(3):
        for i in range(labels.shape[0]):
            if np.count_nonzero(labels[i]) == 0:
                keep = [j for j in range(labels.shape[0]) if j != i]
                audio_input = audio_input[keep]
                video_input = video_input[keep]
                labels = labels[keep]
                break
    return audio_input, video_input, labels


def init_params(key, num_people, audio_len):
    ks = jax.random.split(key, 9)
    u = lambda k, shape, s: (jax.random.uniform(k, shape, jnp.float32) * 2.0 - 1.0) * s
    params = {
        # MeanSoftAttentionFusion
        "wa":  u(ks[0], (AUDIO_DIM, OUT_DIM), 0.05),
        "ba":  u(ks[1], (1, OUT_DIM), 0.05),
        "wi":  u(ks[2], (IMAGE_DIM, OUT_DIM), 0.05),
        "bi":  u(ks[3], (1, OUT_DIM), 0.05),
        "wca": u(ks[4], (AUDIO_DIM, 2), 0.05),   # cross_modality_attention[:256]
        "wcv": u(ks[5], (IMAGE_DIM, 2), 0.05),   # cross_modality_attention[256:]
        "bc":  u(ks[6], (1, 2), 0.05),
        # ArcFace weight (512, num_people); master kept in bf16 so the kernel
        # streams it directly (per-column inv-norm folded in at runtime).
        "warc": u(ks[7], (OUT_DIM, num_people), 0.05).astype(jnp.bfloat16),
    }
    kb = jax.random.split(ks[8], 2)
    backbones = {
        "w_audio_backbone": u(kb[0], (audio_len, AUDIO_DIM), 0.02),
        "w_face_backbone":  u(kb[1], (3, IMAGE_DIM), 0.1),
    }
    return params, backbones


def training_model_forward(audio_input, video_input, labels, params, backbones,
                           tile_n=None):
    # check_dummy (host, dynamic shapes) -> pad batch to static multiple of 16
    audio_np, video_np, labels_np = check_dummy_np(audio_input, video_input, labels)
    b_valid = int(labels_np.shape[0])
    b_pad = max(16, _round_up(max(b_valid, 1), 16))      # bf16 packs (16,128)/vreg

    audio_j = jnp.asarray(audio_np, jnp.float32)
    video_j = jnp.asarray(video_np, jnp.float32)

    # ---- backbones (stand-ins) + MeanSoftAttentionFusion, hoisted to JAX ----
    audio_emb = audio_backbone_standin(audio_j, backbones["w_audio_backbone"])
    face_emb = face_backbone_standin(video_j, backbones["w_face_backbone"])
    video_mean = jnp.mean(face_emb, axis=1)              # frame mean over T

    a_n = _l2norm_rows(audio_emb)
    v_n = _l2norm_rows(video_mean)
    # cross_modality_attention Linear(256+512 -> 2), weight split (no concat)
    att_logits = (a_n @ params["wca"] + v_n @ params["wcv"] + params["bc"])
    att = jax.nn.softmax(att_logits, axis=1)             # exact softmax
    a_t = a_n @ params["wa"] + params["ba"]
    v_t = v_n @ params["wi"] + params["bi"]
    emb = a_t * att[:, 0:1] + v_t * att[:, 1:2]          # (B, 512)
    emb_n = _l2norm_rows(emb)                            # ArcFace input norm

    emb_n = jnp.pad(emb_n, ((0, b_pad - b_valid), (0, 0))).astype(jnp.bfloat16)

    # labels -> argmax indices; padded rows get -1 (masked out of the loss mean)
    # NOTE: argmax assumes exactly one positive per surviving row (single-label).
    labels_idx_np = np.full((b_pad,), -1, dtype=np.int32)
    if b_valid > 0:
        labels_idx_np[:b_valid] = np.argmax(np.asarray(labels_np), axis=1).astype(np.int32)
    labels_idx = jnp.asarray(labels_idx_np)

    num_people = params["warc"].shape[1]
    tn, p_padded, vmem_limit = _choose_tiling(num_people, tile_n)

    # ArcFace weight: stream the raw bf16 master weight; fold the per-column
    # inverse L2 norm into the kernel instead of materializing a normalized
    # copy in HBM every call.
    w_bf = params["warc"].astype(jnp.bfloat16)
    if p_padded != num_people:
        w_bf = jnp.pad(w_bf, ((0, 0), (0, p_padded - num_people)))
    col_ss = jnp.sum(jnp.square(w_bf.astype(jnp.float32)), axis=0, keepdims=True)
    inv_norm = lax.rsqrt(jnp.maximum(col_ss, EPS * EPS))  # (1, p_padded) f32

    return fused_arcface_loss(emb_n, w_bf, inv_norm, labels_idx, b_valid,
                              num_people, tn, p_padded, vmem_limit)


if __name__ == "__main__":
    key = jax.random.PRNGKey(0)
    k_a, k_v, k_p = jax.random.split(key, 3)

    # small shapes; tile_n=128 so the class grid has 3 steps (exercises the
    # online logsumexp carry, padded-column masking and padded-row masking)
    B0, T, P, AUDIO_LEN = 3, 4, 300, 400
    audio_input = jax.random.normal(k_a, (B0, AUDIO_LEN), jnp.float32)
    video_input = jax.random.normal(k_v, (B0, T, 3, 112, 112), jnp.float32)

    labels = np.zeros((B0, P), dtype=np.float32)
    labels[0, 2] = 1.0
    labels[1, 250] = 1.0
    # labels[2] left all-zero -> removed by check_dummy

    params, backbones = init_params(k_p, P, AUDIO_LEN)

    loss = training_model_forward(audio_input, video_input, labels, params,
                                  backbones, tile_n=128)
    loss = jax.block_until_ready(loss)
    assert np.isfinite(np.asarray(loss)), "loss is not finite"
    print("KERNEL_OK")
</pallas_src>

<mosaic_0001>
module attributes {stable_mosaic.version = 11 : i64} {
  func.func @arcface_loss_kernel(%arg0: i32, %arg1: memref<1xi32, #tpu.memory_space<smem>>, %arg2: memref<16x1xi32, #tpu.memory_space<vmem>>, %arg3: memref<16x512xbf16, #tpu.memory_space<vmem>>, %arg4: memref<512x128xbf16, #tpu.memory_space<vmem>>, %arg5: memref<1x128xf32, #tpu.memory_space<vmem>>, %arg6: memref<1x1xf32, #tpu.memory_space<vmem>>, %arg7: memref<16x1xf32, #tpu.memory_space<vmem>>, %arg8: memref<16x1xf32, #tpu.memory_space<vmem>>, %arg9: memref<16x1xf32, #tpu.memory_space<vmem>>) attributes {dimension_semantics = [#tpu.dimension_semantics<arbitrary>], iteration_bounds = array<i64: 3>, scalar_prefetch = 1 : i64, scratch_operands = 3 : i64, tpu.core_type = #tpu.core_type<tc>, window_params = [{pipeline_mode = #tpu.pipeline_mode<synchronous>, transform_indices = @transform_0, window_bounds = array<i64: 16, 1>}, {pipeline_mode = #tpu.pipeline_mode<synchronous>, transform_indices = @transform_1, window_bounds = array<i64: 16, 512>}, {transform_indices = @transform_2, window_bounds = array<i64: 512, 128>}, {transform_indices = @transform_3, window_bounds = array<i64: 1, 128>}, {pipeline_mode = #tpu.pipeline_mode<synchronous>, transform_indices = @transform_4, window_bounds = array<i64: 1, 1>}]} {
    %c0_i32 = arith.constant 0 : i32
    %0 = arith.cmpi eq, %arg0, %c0_i32 : i32
    %1 = arith.extui %0 : i1 to i32
    %c0_i32_0 = arith.constant 0 : i32
    %2 = arith.cmpi ne, %1, %c0_i32_0 : i32
    scf.if %2 {
      %cst_34 = arith.constant -1.000000e+30 : f32
      %67 = vector.broadcast %cst_34 : f32 to vector<16x1xf32>
      %c0_35 = arith.constant 0 : index
      %c0_36 = arith.constant 0 : index
      %68 = vector.load %arg7[%c0_35, %c0_36] : memref<16x1xf32, #tpu.memory_space<vmem>>, vector<16x1xf32>
      tpu.vector_store %arg7[%c0_35, %c0_36], %67 {strides = array<i32>} : memref<16x1xf32, #tpu.memory_space<vmem>>, vector<16x1xf32>,
      %cst_37 = arith.constant 0.000000e+00 : f32
      %69 = vector.broadcast %cst_37 : f32 to vector<16x1xf32>
      %c0_38 = arith.constant 0 : index
      %c0_39 = arith.constant 0 : index
      %70 = vector.load %arg8[%c0_38, %c0_39] : memref<16x1xf32, #tpu.memory_space<vmem>>, vector<16x1xf32>
      tpu.vector_store %arg8[%c0_38, %c0_39], %69 {strides = array<i32>} : memref<16x1xf32, #tpu.memory_space<vmem>>, vector<16x1xf32>,
      %cst_40 = arith.constant 0.000000e+00 : f32
      %71 = vector.broadcast %cst_40 : f32 to vector<16x1xf32>
      %c0_41 = arith.constant 0 : index
      %c0_42 = arith.constant 0 : index
      %72 = vector.load %arg9[%c0_41, %c0_42] : memref<16x1xf32, #tpu.memory_space<vmem>>, vector<16x1xf32>
      tpu.vector_store %arg9[%c0_41, %c0_42], %71 {strides = array<i32>} : memref<16x1xf32, #tpu.memory_space<vmem>>, vector<16x1xf32>,
    } else {
    }
    %c0 = arith.constant 0 : index
    %c0_1 = arith.constant 0 : index
    %3 = vector.load %arg3[%c0, %c0_1] : memref<16x512xbf16, #tpu.memory_space<vmem>>, vector<16x512xbf16>
    %c0_2 = arith.constant 0 : index
    %c0_3 = arith.constant 0 : index
    %4 = vector.load %arg4[%c0_2, %c0_3] : memref<512x128xbf16, #tpu.memory_space<vmem>>, vector<512x128xbf16>
    %cst = arith.constant dense<0.000000e+00> : vector<16x128xf32>
    %5 = tpu.matmul %3, %4, %cst {dimension_numbers = #tpu.dot_dimension_numbers<[1], [0], [0], [1], [0, 0, 1, 1], [], []>} : vector<16x512xbf16>, vector<512x128xbf16>, vector<16x128xf32> -> vector<16x128xf32>
    %c0_4 = arith.constant 0 : index
    %c0_5 = arith.constant 0 : index
    %6 = vector.load %arg5[%c0_4, %c0_5] : memref<1x128xf32, #tpu.memory_space<vmem>>, vector<1x128xf32>
    %7 = vector.broadcast %6 : vector<1x128xf32> to vector<16x128xf32>
    %8 = arith.mulf %5, %7 : vector<16x128xf32>
    %cst_6 = arith.constant -0.99999988 : f32
    %cst_7 = arith.constant 0.99999988 : f32
    %9 = vector.broadcast %cst_6 : f32 to vector<16x128xf32>
    %10 = arith.maximumf %9, %8 : vector<16x128xf32>
    %11 = vector.broadcast %cst_7 : f32 to vector<16x128xf32>
    %12 = arith.minimumf %11, %10 : vector<16x128xf32>
    %13 = arith.mulf %12, %12 : vector<16x128xf32>
    %cst_8 = arith.constant 1.000000e+00 : f32
    %14 = vector.broadcast %cst_8 : f32 to vector<16x128xf32>
    %15 = arith.subf %14, %13 : vector<16x128xf32>
    %16 = math.sqrt %15 : vector<16x128xf32>
    %cst_9 = arith.constant 0.980066597 : f32
    %17 = vector.broadcast %cst_9 : f32 to vector<16x128xf32>
    %18 = arith.mulf %12, %17 : vector<16x128xf32>
    %cst_10 = arith.constant 0.198669329 : f32
    %19 = vector.broadcast %cst_10 : f32 to vector<16x128xf32>
    %20 = arith.mulf %16, %19 : vector<16x128xf32>
    %21 = arith.subf %18, %20 : vector<16x128xf32>
    %cst_11 = arith.constant -0.980066597 : f32
    %22 = vector.broadcast %cst_11 : f32 to vector<16x128xf32>
    %23 = arith.cmpf ogt, %12, %22 : vector<16x128xf32>
    %cst_12 = arith.constant 0.0397338644 : f32
    %24 = vector.broadcast %cst_12 : f32 to vector<16x128xf32>
    %25 = arith.subf %12, %24 : vector<16x128xf32>
    %26 = arith.select %23, %21, %25 : vector<16x128xi1>, vector<16x128xf32>
    %27 = tpu.iota {dimensions = array<i32: 1>} : vector<16x128xi32>
    %c128_i32 = arith.constant 128 : i32
    %28 = arith.muli %arg0, %c128_i32 : i32
    %29 = vector.broadcast %28 : i32 to vector<16x128xi32>
    %30 = arith.addi %27, %29 : vector<16x128xi32>
    %c0_13 = arith.constant 0 : index
    %c0_14 = arith.constant 0 : index
    %31 = vector.load %arg2[%c0_13, %c0_14] : memref<16x1xi32, #tpu.memory_space<vmem>>, vector<16x1xi32>
    %32 = vector.broadcast %31 : vector<16x1xi32> to vector<16x128xi32>
    %33 = arith.cmpi eq, %30, %32 : vector<16x128xi32>
    %34 = arith.select %33, %26, %12 : vector<16x128xi1>, vector<16x128xf32>
    %cst_15 = arith.constant 3.000000e+01 : f32
    %35 = vector.broadcast %cst_15 : f32 to vector<16x128xf32>
    %36 = arith.mulf %35, %34 : vector<16x128xf32>
    %c300_i32 = arith.constant 300 : i32
    %37 = vector.broadcast %c300_i32 : i32 to vector<16x128xi32>
    %38 = arith.cmpi slt, %30, %37 : vector<16x128xi32>
    %cst_16 = arith.constant -1.000000e+30 : f32
    %39 = vector.broadcast %cst_16 : f32 to vector<16x128xf32>
    %40 = arith.select %38, %36, %39 : vector<16x128xi1>, vector<16x128xf32>
    %cst_17 = arith.constant dense<0xFF800000> : vector<16xf32>
    %41 = vector.multi_reduction <maximumf>, %40, %cst_17 [1] : vector<16x128xf32> to vector<16xf32>
    %42 = vector.shape_cast %41 : vector<16xf32> to vector<16x1xf32>
    %c0_18 = arith.constant 0 : index
    %c0_19 = arith.constant 0 : index
    %43 = vector.load %arg7[%c0_18, %c0_19] : memref<16x1xf32, #tpu.memory_space<vmem>>, vector<16x1xf32>
    %44 = arith.maximumf %43, %42 : vector<16x1xf32>
    %45 = arith.subf %43, %44 : vector<16x1xf32>
    %46 = math.exp %45 : vector<16x1xf32>
    %47 = vector.broadcast %44 : vector<16x1xf32> to vector<16x128xf32>
    %48 = arith.subf %40, %47 : vector<16x128xf32>
    %49 = math.exp %48 : vector<16x128xf32>
    %c0_20 = arith.constant 0 : index
    %c0_21 = arith.constant 0 : index
    %50 = vector.load %arg8[%c0_20, %c0_21] : memref<16x1xf32, #tpu.memory_space<vmem>>, vector<16x1xf32>
    %51 = arith.mulf %46, %50 : vector<16x1xf32>
    %cst_22 = arith.constant dense<0.000000e+00> : vector<16xf32>
    %52 = vector.multi_reduction <add>, %49, %cst_22 [1] : vector<16x128xf32> to vector<16xf32>
    %53 = vector.shape_cast %52 : vector<16xf32> to vector<16x1xf32>
    %54 = arith.addf %51, %53 : vector<16x1xf32>
    %c0_23 = arith.constant 0 : index
    %c0_24 = arith.constant 0 : index
    %55 = vector.load %arg8[%c0_23, %c0_24] : memref<16x1xf32, #tpu.memory_space<vmem>>, vector<16x1xf32>
    tpu.vector_store %arg8[%c0_23, %c0_24], %54 {strides = array<i32>} : memref<16x1xf32, #tpu.memory_space<vmem>>, vector<16x1xf32>,
    %c0_25 = arith.constant 0 : index
    %c0_26 = arith.constant 0 : index
    %56 = vector.load %arg7[%c0_25, %c0_26] : memref<16x1xf32, #tpu.memory_space<vmem>>, vector<16x1xf32>
    tpu.vector_store %arg7[%c0_25, %c0_26], %44 {strides = array<i32>} : memref<16x1xf32, #tpu.memory_space<vmem>>, vector<16x1xf32>,
    %c0_27 = arith.constant 0 : index
    %c0_28 = arith.constant 0 : index
    %57 = vector.load %arg9[%c0_27, %c0_28] : memref<16x1xf32, #tpu.memory_space<vmem>>, vector<16x1xf32>
    %cst_29 = arith.constant 0.000000e+00 : f32
    %58 = vector.broadcast %cst_29 : f32 to vector<16x128xf32>
    %59 = arith.select %33, %40, %58 : vector<16x128xi1>, vector<16x128xf32>
    %cst_30 = arith.constant dense<0.000000e+00> : vector<16xf32>
    %60 = vector.multi_reduction <add>, %59, %cst_30 [1] : vector<16x128xf32> to vector<16xf32>
    %61 = vector.shape_cast %60 : vector<16xf32> to vector<16x1xf32>
    %62 = arith.addf %57, %61 : vector<16x1xf32>
    %c0_31 = arith.constant 0 : index
    %c0_32 = arith.constant 0 : index
    %63 = vector.load %arg9[%c0_31, %c0_32] : memref<16x1xf32, #tpu.memory_space<vmem>>, vector<16x1xf32>
    tpu.vector_store %arg9[%c0_31, %c0_32], %62 {strides = array<i32>} : memref<16x1xf32, #tpu.memory_space<vmem>>, vector<16x1xf32>,
    %c2_i32 = arith.constant 2 : i32
    %64 = arith.cmpi eq, %arg0, %c2_i32 : i32
    %65 = arith.extui %64 : i1 to i32
    %c0_i32_33 = arith.constant 0 : i32
    %66 = arith.cmpi ne, %65, %c0_i32_33 : i32
    scf.if %66 {
      %c0_34 = arith.constant 0 : index
      %c0_35 = arith.constant 0 : index
      %67 = vector.load %arg7[%c0_34, %c0_35] : memref<16x1xf32, #tpu.memory_space<vmem>>, vector<16x1xf32>
      %c0_36 = arith.constant 0 : index
      %c0_37 = arith.constant 0 : index
      %68 = vector.load %arg8[%c0_36, %c0_37] : memref<16x1xf32, #tpu.memory_space<vmem>>, vector<16x1xf32>
      %69 = math.log %68 : vector<16x1xf32>
      %70 = arith.addf %67, %69 : vector<16x1xf32>
      %c0_38 = arith.constant 0 : index
      %c0_39 = arith.constant 0 : index
      %71 = vector.load %arg9[%c0_38, %c0_39] : memref<16x1xf32, #tpu.memory_space<vmem>>, vector<16x1xf32>
      %72 = arith.subf %70, %71 : vector<16x1xf32>
      %c0_40 = arith.constant 0 : index
      %73 = memref.load %arg1[%c0_40] : memref<1xi32, #tpu.memory_space<smem>>
      %74 = tpu.iota {dimensions = array<i32: 0>} : vector<16x1xi32>
      %75 = vector.broadcast %73 : i32 to vector<16x1xi32>
      %76 = arith.cmpi slt, %74, %75 : vector<16x1xi32>
      %cst_41 = arith.constant 0.000000e+00 : f32
      %77 = vector.broadcast %cst_41 : f32 to vector<16x1xf32>
      %78 = arith.select %76, %72, %77 : vector<16x1xi1>, vector<16x1xf32>
      %c1_i32 = arith.constant 1 : i32
      %79 = arith.maxsi %73, %c1_i32 : i32
      %80 = arith.sitofp %79 : i32 to f32
      %81 = vector.shape_cast %78 : vector<16x1xf32> to vector<1x16x1xf32>
      %cst_42 = arith.constant dense<0.000000e+00> : vector<1xf32>
      %82 = vector.multi_reduction <add>, %81, %cst_42 [1, 2] : vector<1x16x1xf32> to vector<1xf32>
      %83 = vector.shape_cast %82 : vector<1xf32> to vector<1x1x1xf32>
      %84 = vector.extract %83[0, 0, 0] : f32 from vector<1x1x1xf32>
      %85 = arith.divf %84, %80 : f32
      %86 = vector.broadcast %85 : f32 to vector<1x1xf32>
      %c0_43 = arith.constant 0 : index
      %c0_44 = arith.constant 0 : index
      %87 = vector.load %arg6[%c0_43, %c0_44] : memref<1x1xf32, #tpu.memory_space<vmem>>, vector<1x1xf32>
      tpu.vector_store %arg6[%c0_43, %c0_44], %86 {strides = array<i32>} : memref<1x1xf32, #tpu.memory_space<vmem>>, vector<1x1xf32>,
    } else {
    }
    return
  }
  func.func @transform_0(%arg0: i32, %arg1: memref<1xi32, #tpu.memory_space<smem>>) -> (i32, i32) {
    %c0_i32 = arith.constant 0 : i32
    %c0_i32_0 = arith.constant 0 : i32
    %c0_i32_1 = arith.constant 0 : i32
    return %c0_i32, %c0_i32_0 : i32, i32
  }
  func.func @transform_1(%arg0: i32, %arg1: memref<1xi32, #tpu.memory_space<smem>>) -> (i32, i32) {
    %c0_i32 = arith.constant 0 : i32
    %c0_i32_0 = arith.constant 0 : i32
    %c0_i32_1 = arith.constant 0 : i32
    return %c0_i32, %c0_i32_0 : i32, i32
  }
  func.func @transform_2(%arg0: i32, %arg1: memref<1xi32, #tpu.memory_space<smem>>) -> (i32, i32) {
    %c0_i32 = arith.constant 0 : i32
    %c0_i32_0 = arith.constant 0 : i32
    return %c0_i32, %arg0 : i32, i32
  }
  func.func @transform_3(%arg0: i32, %arg1: memref<1xi32, #tpu.memory_space<smem>>) -> (i32, i32) {
    %c0_i32 = arith.constant 0 : i32
    %c0_i32_0 = arith.constant 0 : i32
    return %c0_i32, %arg0 : i32, i32
  }
  func.func @transform_4(%arg0: i32, %arg1: memref<1xi32, #tpu.memory_space<smem>>) -> (i32, i32) {
    %c0_i32 = arith.constant 0 : i32
    %c0_i32_0 = arith.constant 0 : i32
    %c0_i32_1 = arith.constant 0 : i32
    return %c0_i32, %c0_i32_0 : i32, i32
  }
}

</mosaic_0001>

<bundles_post_ra>
// kernel: tpu_custom_call.1
= control target key start
LH: loop header
LB: loop body
LE: loop exit
PB: predicated region body
PF: predicated region fallthrough
CT: control target
= control target key end

     0   :  { %s1508_s0 = inlined_call_operand.<no memory space> [shape: s32[1], index: 0, kind: input, shape index: {}]   ;;  %s1509_s1 = inlined_call_operand.vmem [shape: s32[16,1], index: 1, kind: input, shape index: {}]   ;;  %s1510_s2 = inlined_call_operand.hbm [shape: bf16[16,512], index: 2, kind: input, shape index: {}]   ;;  %s1511_s3 = inlined_call_operand.hbm [shape: bf16[512,384], index: 3, kind: input, shape index: {}]   ;;  %s1512_s4 = inlined_call_operand.vmem [shape: f32[1,384], index: 4, kind: input, shape index: {}]   ;;  %s1513_s5 = inlined_call_operand.hbm [shape: f32[1,1], index: 5, kind: output, shape index: {}]  }
   0x1   :  { %10 = sst [smem:[#allocation6]] %s1508_s0 }
   0x2   :  { %11 = vsyncpa [#allocation8], 0 }
   0x3   :  { %12 = vsyncpa [#allocation11], 0 }
   0x4   :  { %14 = vsyncpa [#allocation11 + $0x1], 0 }
   0x5   :  { %15 = vsyncpa [#allocation9], 0  ;;  %s1321_s20 = smov 0   ;;  %s1323_s21 = smov 0  }
   0x6   :  { %s1325_s22 = smov 0   ;;  %s1327_s23 = smov 0  }
   0x7 LB: > { %s1340_s0 = sadd.s32 4294967295, %s1276_s23   ;;  %p83_p0 = scmp.ne.s32.totalorder %s1268_s21, %s1264_s20  ;;  %s1276_s23 = sphi %s1327_s23, %s1520_s23   ;;  %s1272_s22 = sphi %s1325_s22, %s1519_s22   ;;  %s1268_s21 = sphi %s1323_s21, %s1518_s21   ;;  %s1264_s20 = sphi %s1321_s20, %s1517_s20  }
   0x8   : > { %p84_p1 = scmp.eq.s32.totalorder %s1340_s0, 0  ;;  %p857_p2 = scmp.ge.s32.totalorder %s1276_s23, 1 }
   0x9   : > { %p141_p3 = scmp.lt.s32.totalorder %s1276_s23, 4  ;;  %p858_p4 = scmp.ne.s32.totalorder %s1340_s0, 0 }
   0xa   : > { %p1349_p5 = por %p84_p1, %p83_p0  ;;  %s155_s27 = sshll.u32 %s1510_s2, 4  ;;  %s156_s27 = int_to_ptr.hbm [resolvable:$true] %s155_s27 }
   0xb   : > { %p1356_p6 = pnand %p857_p2, %p141_p3  ;;  %s1278_s29 = smov [#allocation7]  }
   0xc   : > { %s157_s30 = sshll.u32 %s1278_s29, 4  ;;  %s1365_s6 = sadd.s32 1, %s1276_s23   ;;  %s158_s30 = int_to_ptr.vmem [resolvable:$true] %s157_s30 }
   0xd   : > { %p1070_p7 = pneg %p1356_p6  ;;  %s1279_s7 = smov 256  }
   0xe   : > { %s1280_s8 = smov 16   ;;  %s67_s9 = ssub.s32 %s1276_s23, %s1365_s6 }
   0xf   : > { %p1071_p8 = pnand %p1070_p7, %p84_p1  ;;  %s70_s10 = sadd.s32 1, %s1272_s22 }
  0x10   : > { %p68_p9 = scmp.eq.s32.totalorder %s67_s9, 0  ;;  %p77_p10 = scmp.ne.s32.totalorder %s1272_s22, %s1268_s21 }
  0x11   : > { %1073 = dma.hbm_to_vmem [thread:$0]  (!%p1071_p8), %s156_s27, 512, %s158_s30, [#allocation8], %s1279_s7, %s1279_s7, %s1280_s8  }
  0x12   : > { %p78_p11 = scmp.eq.s32.totalorder %s1276_s23, 0  ;;  %p1079_p12 = scmp.lt.s32.totalorder %s1276_s23, 3 }
  0x13   : > { %s1375_s11 = scalar_select %p68_p9, %s1272_s22, %s70_s10  }
  0x14   : > { %p79_p13 = por %p78_p11, %p77_p10  ;;  %s171_s12 = sand.u32 1, %s1272_s22  }
  0x15   : > { %s860_s13 = sshll.u32 %s171_s12, 8  ;;  %s861_s14 = sshll.u32 %s1276_s23, 2 }
  0x16   : > { %s179_s17 = scalar_lea.hbm %s1511_s3, %s861_s14  ;;  %s175_s18 = scalar_lea.vmem [#allocation10], %s860_s13 }
  0x17   : > { %s182_s19 = sshll.u32 %s175_s18, 4  ;;  %s180_s20 = sshll.u32 %s179_s17, 4  ;;  %s183_s19 = int_to_ptr.vmem [resolvable:$true] %s182_s19  ;;  %s181_s20 = int_to_ptr.hbm [resolvable:$true] %s180_s20 }
  0x18   : > { %p1382_p0 = pnand %p1079_p12, %p79_p13  ;;  %s172_s26 = scalar_lea.sflag [#allocation11], %s171_s12 }
  0x19   : > { %s1176_s27 = sshra.s32 %s181_s20, 4  ;;  %s1183_s7 = scalar_lea.hbm %s1511_s3, 768  ;;  %s1177_s27 = int_to_ptr.hbm [resolvable:$true] %s1176_s27 }
  0x1a   : > { %s1178_s29 = scalar_lea.hbm %s1177_s27, 256  ;;  %p1180_p3 = pneg %p1382_p0 }
  0x1b   : > { %p1179_p2 = scmp.ne.s32.totalorder %s1177_s27, %s1178_s29  ;;  %p1184_p9 = scmp.lt.s32.totalorder %s1177_s27, %s1511_s3 }
  0x1c   : > { %p1185_p10 = scmp.lt.s32.totalorder %s1183_s7, %s1178_s29 }
  0x1d   : > { %p1181_p7 = pnand %p1180_p3, %p1179_p2 }
  0x1e   : > { %p1186_p11 = por %p1185_p10, %p1184_p9 }
  0x1f   : > { %p1182_p8 = pneg %p1181_p7 }
  0x21   : > { %p1187_p12 = pnand %p1186_p11, %p1182_p8 }
  0x23   : > { %1190 = shalt.err (!%p1187_p12)
}
  0x24   : > { %s1281_s10 = smov 192   ;;  %s1282_s12 = smov 64  }
  0x25   : > { %s1283_s13 = smov 4   ;;  %200 = sbr.rel (%p1356_p6) target bundleno = 829 (0x33d), region = 36 }
  0x26   : > { %1077 = dma.hbm_to_vmem [thread:$0]  (!%p1382_p0), %s181_s20, 4096, %s183_s19, %s172_s26, %s1281_s10, %s1282_s12, %s1283_s13  }
  0x2a   : > { %1251 = dma.done.wait (%p84_p1), [#allocation8], 512  }
  0x2b   : > { %1253 = vsyncadd (%p84_p1), [#allocation8], 4294966784  ;;  %s207_s14 = sand.u32 1, %s1268_s21  }
  0x2c   : > { %s864_s15 = sshll.u32 %s207_s14, 8  ;;  %s208_s16 = scalar_lea.sflag [#allocation11], %s207_s14 }
  0x2d   : > { %s1403_s17 = scalar_lea.vmem [#allocation10], %s864_s15 }
  0x2e   : > { %1255 = dma.done.wait (%p1349_p5), %s208_s16, 4096  }
  0x2f   : > { %1257 = vsyncadd (%p1349_p5), %s208_s16, 4294963200  ;;  %p235_p6 = scmp.lt.s32.totalorder %s1340_s0, 2  ;;  %241 = sbr.rel (%p858_p4) target bundleno = 59 (0x3b), region = 48 }
  0x31   : > { %s1411_s28 = scalar_select %p235_p6, %s1340_s0, 2 }
  0x33   : > { %s237_s20 = scalar_lea.vmem %s1512_s4, %s1411_s28 }
  0x34   : > { %vm242_vm0 = vcmask 7168   ;;  %v1284_v0 = vmov -1e+30   ;;  %v1285_v1 = vmov 0.0  }
  0x35   : > { %243 = vst.msk [vmem:[#allocation2] sm:$0xff] %vm242_vm0, %v1284_v0 }
  0x36   : > { %244 = vst.msk [vmem:[#allocation2 + $0x8] sm:$0xff] %vm242_vm0, %v1284_v0 }
  0x37   : > { %245 = vst.msk [vmem:[#allocation3] sm:$0xff] %vm242_vm0, %v1285_v1 }
  0x38   : > { %246 = vst.msk [vmem:[#allocation3 + $0x8] sm:$0xff] %vm242_vm0, %v1285_v1 }
  0x39   : > { %247 = vst.msk [vmem:[#allocation4] sm:$0xff] %vm242_vm0, %v1285_v1 }
  0x3a   : > { %248 = vst.msk [vmem:[#allocation4 + $0x8] sm:$0xff] %vm242_vm0, %v1285_v1 }
  0x3b PF: > { %v1031_v2 = vld [vmem:[%s1403_s17 + $0x38] sm:$0xff]  ;;  %v1030_v6 = vld [vmem:[%s1403_s17 + $0x30] sm:$0xff]  ;;  %v1286_v10 = vmov 0   ;;  %v1029_v11 = vld [vmem:[%s1403_s17 + $0x28] sm:$0xff]  ;;  %s1014_s30 = sshll.u32 %s1340_s0, 7  ;;  %vm697_vm10 = vcmask 7168  }
  0x3c   : > { %v1039_v3 = vld [vmem:[%s1403_s17 + $0x78] sm:$0xff]  ;;  %529 = vmatpush.bf16.msra.mxu0 %v1031_v2  ;;  %v1038_v7 = vld [vmem:[%s1403_s17 + $0x70] sm:$0xff]  ;;  %1125 = vset.pattern.permute.xlu0 %v1286_v10  ;;  %v1037_v12 = vld [vmem:[%s1403_s17 + $0x68] sm:$0xff]  ;;  %p1015_p1 = scmp.ne.s32.totalorder %s1340_s0, 2 }
  0x3d   : > { %v1047_v4 = vld [vmem:[%s1403_s17 + $0xb8] sm:$0xff]  ;;  %543 = vmatpush.bf16.msra.mxu1 %v1039_v3  ;;  %v1046_v8 = vld [vmem:[%s1403_s17 + $0xb0] sm:$0xff]  ;;  %1126 = vset.pattern.permute.xlu2 %v1286_v10  ;;  %v1045_v13 = vld [vmem:[%s1403_s17 + $0xa8] sm:$0xff]  ;;  %s732_s7 = sld [smem:[#allocation6]] (!%p1015_p1) }
  0x3e   : > { %v1055_v5 = vld [vmem:[%s1403_s17 + $0xf8] sm:$0xff]  ;;  %557 = vmatpush.bf16.msra.mxu2 %v1047_v4  ;;  %v1054_v9 = vld [vmem:[%s1403_s17 + $0xf0] sm:$0xff]  ;;  %v1053_v14 = vld [vmem:[%s1403_s17 + $0xe8] sm:$0xff] }
  0x3f   : > { %571 = vmatpush.bf16.msra.mxu3 %v1055_v5  ;;  %v1028_v15 = vld [vmem:[%s1403_s17 + $0x20] sm:$0xff]  ;;  %v640_v19 = vld [vmem:[%s1509_s1] sm:$0xff]  ;;  %v1027_v20 = vld [vmem:[%s1403_s17 + $0x18] sm:$0xff] }
  0x40   : > { %530 = vmatpush.bf16.msra.mxu0 %v1030_v6  ;;  %v1036_v16 = vld [vmem:[%s1403_s17 + $0x60] sm:$0xff]  ;;  %v1035_v21 = vld [vmem:[%s1403_s17 + $0x58] sm:$0xff]  ;;  %643 = vperm.xlu0 %1125, %v640_v19   ;;  %v1026_v24 = vld [vmem:[%s1403_s17 + $0x10] sm:$0xff] }
  0x41   : > { %544 = vmatpush.bf16.msra.mxu1 %v1038_v7  ;;  %v1044_v17 = vld [vmem:[%s1403_s17 + $0xa0] sm:$0xff]  ;;  %v1043_v22 = vld [vmem:[%s1403_s17 + $0x98] sm:$0xff]  ;;  %v1034_v25 = vld [vmem:[%s1403_s17 + $0x50] sm:$0xff] }
  0x42   : > { %558 = vmatpush.bf16.msra.mxu2 %v1046_v8  ;;  %v1052_v18 = vld [vmem:[%s1403_s17 + $0xe0] sm:$0xff]  ;;  %v1051_v23 = vld [vmem:[%s1403_s17 + $0xd8] sm:$0xff]  ;;  %v1042_v26 = vld [vmem:[%s1403_s17 + $0x90] sm:$0xff] }
  0x43   : > { %572 = vmatpush.bf16.msra.mxu3 %v1054_v9  ;;  %v1050_v27 = vld [vmem:[%s1403_s17 + $0xd0] sm:$0xff]  ;;  %v641_v28 = vld [vmem:[%s1509_s1 + $0x8] sm:$0xff]  ;;  %v1025_v29 = vld [vmem:[%s1403_s17 + $0x8] sm:$0xff]  ;;  %p741_p4 = scmp.gt.s32.totalorder (!%p1015_p1), %s732_s7, 1 }
  0x44   : > { %531 = vmatpush.bf16.msra.mxu0 %v1029_v11  ;;  %v1033_v30 = vld [vmem:[%s1403_s17 + $0x48] sm:$0xff]  ;;  %v1024_v33 = vld [vmem:[%s1403_s17] sm:$0xff]  ;;  %v1022_v38 = vld [vmem:[#allocation7 + $0xc] sm:$0xf0] }
  0x45   : > { %545 = vmatpush.bf16.msra.mxu1 %v1037_v12  ;;  %v1041_v31 = vld [vmem:[%s1403_s17 + $0x88] sm:$0xff]  ;;  %v1032_v34 = vld [vmem:[%s1403_s17 + $0x40] sm:$0xff]  ;;  %v870_v40 = vld [vmem:[#allocation7 + $0x10] sm:$0xf0]  ;;  %v635_v12 = vlaneseq }
  0x46   : > { %559 = vmatpush.bf16.msra.mxu2 %v1045_v13  ;;  %v1049_v32 = vld [vmem:[%s1403_s17 + $0xc8] sm:$0xff]  ;;  %v1040_v35 = vld [vmem:[%s1403_s17 + $0x80] sm:$0xff]  ;;  %v1023_v42 = vld [vmem:[#allocation7 + $0x14] sm:$0xf0] }
  0x47   : > { %573 = vmatpush.bf16.msra.mxu3 %v1053_v14  ;;  %v1048_v36 = vld [vmem:[%s1403_s17 + $0xc0] sm:$0xff]  ;;  %v876_v41 = vld [vmem:[#allocation7 + $0x8] sm:$0xf]  ;;  %v1021_v43 = vld [vmem:[#allocation7 + $0xc] sm:$0xf] }
  0x48   : > { %532 = vmatpush.bf16.msra.mxu0 %v1028_v15  ;;  %646 = vperm.xlu0 %1125, %v641_v28   ;;  %v868_v37 = vld [vmem:[#allocation7] sm:$0xf]  ;;  %v1020_v39 = vld [vmem:[#allocation7 + $0x4] sm:$0xf]  ;;  %v878_v44 = vld [vmem:[#allocation7 + $0x18] sm:$0xf0]  ;;  %v877_v47 = vor.u32 %v1023_v42, %v876_v41 }
  0x49   : > { %546 = vmatpush.bf16.msra.mxu1 %v1036_v16  ;;  %v869_v45 = vor.u32 %v1022_v38, %v868_v37  ;;  %v873_v46 = vor.u32 %v1020_v39, %v870_v40  ;;  %v881_v48 = vor.u32 %v1021_v43, %v878_v44  ;;  %v1127_v55 = vld [vmem:[%s237_s20] ss:$0 sm:$0xff]  ;;  %v636_v16 = vand.u32 127, %v635_v12 }
  0x4a   : > { %560 = vmatpush.bf16.msra.mxu2 %v1044_v17 }
  0x4b   : > { %574 = vmatpush.bf16.msra.mxu3 %v1052_v18  ;;  %v638_v18 = vstv %s1014_s30 }
  0x4c   : > { %533 = vmatpush.bf16.msra.mxu0 %v1027_v20 }
  0x4d   : > { %547 = vmatpush.bf16.msra.mxu1 %v1035_v21 }
  0x4e   : > { %561 = vmatpush.bf16.msra.mxu2 %v1043_v22 }
  0x4f   : > { %575 = vmatpush.bf16.msra.mxu3 %v1051_v23  ;;  %v1464_v23 = vadd.s32 %v638_v18, %v636_v16  ;;  %v688_v16 = vld [vmem:[#allocation3 + $0x8] sm:$0xff] }
  0x50   : > { %534 = vmatpush.bf16.msra.mxu0 %v1026_v24 }
  0x51   : > { %548 = vmatpush.bf16.msra.mxu1 %v1034_v25  ;;  %vm654_vm6 = vcmp.lt.s32.totalorder %v1464_v23, 300 }
  0x52   : > { %562 = vmatpush.bf16.msra.mxu2 %v1042_v26 }
  0x53   : > { %576 = vmatpush.bf16.msra.mxu3 %v1050_v27 }
  0x54   : > { %535 = vmatpush.bf16.msra.mxu0 %v1025_v29 }
  0x55   : > { %549 = vmatpush.bf16.msra.mxu1 %v1033_v30 }
  0x56   : > { %563 = vmatpush.bf16.msra.mxu2 %v1041_v31 }
  0x57   : > { %577 = vmatpush.bf16.msra.mxu3 %v1049_v32 }
  0x58   : > { %536 = vmatpush.bf16.msra.mxu0 %v1024_v33 }
  0x59   : > { %550 = vmatpush.bf16.msra.mxu1 %v1032_v34 }
  0x5a   : > { %564 = vmatpush.bf16.msra.mxu2 %v1040_v35 }
  0x5b   : > { %578 = vmatpush.bf16.msra.mxu3 %v1048_v36  ;;  %537 = vmatmul.bf16.vlgmr.msra.gmra.mxu0 %v869_v45 }
  0x5c   : > { %551 = vmatmul.bf16.vlgmr.msra.gmra.mxu1 %v873_v46 }
  0x5d   : > { %565 = vmatmul.bf16.vlgmr.msra.gmra.mxu2 %v877_v47 }
  0x5e   : > { %579 = vmatmul.bf16.vlgmr.msra.gmra.mxu3 %v881_v48 }
  0xb2   : > { %v644_v25 = vpop.permute.xlu0 %643 }
  0xb3   : > { %vm648_vm3 = vcmp.eq.s32.totalorder %v1464_v23, %v644_v25 }
  0xba   : > { %v647_v43 = vpop.permute.xlu0 %646 }
  0xbb   : > { %vm649_vm9 = vcmp.eq.s32.totalorder %v1464_v23, %v647_v43 }
  0xd8   : > { %v538_v49 = vpop.f32.mrf.mxu0 }
  0xd9   : > { %v552_v50 = vpop.f32.mrf.mxu1 }
  0xda   : > { %v553_v51 = vadd.f32 %v552_v50, %v538_v49  ;;  %v661_v50 = vld [vmem:[#allocation2] sm:$0xff] }
  0xe0   : > { %v566_v52 = vpop.f32.mrf.mxu2  ;;  %v540_v57 = vpop.f32.mrf.mxu0 }
  0xe1   : > { %v580_v53 = vpop.f32.mrf.mxu3  ;;  %v567_v54 = vadd.f32 %v566_v52, %v553_v51  ;;  %v554_v58 = vpop.f32.mrf.mxu1 }
  0xe2   : > { %v555_v61 = vadd.f32 %v554_v58, %v540_v57 }
  0xe3   : > { %v581_v56 = vadd.f32 %v580_v53, %v567_v54  ;;  %v662_v54 = vld [vmem:[#allocation2 + $0x8] sm:$0xff] }
  0xe5   : > { %v589_v59 = vmul.f32 %v1127_v55, %v581_v56 }
  0xe7   : > { %v1010_v60 = vclamps-f32 %v589_v59, 0.9999999 }
  0xe8   : > { %v568_v62 = vpop.f32.mrf.mxu2 }
  0xe9   : > { %v595_v63 = vmul.f32 %v1010_v60, %v1010_v60  ;;  %v569_v0 = vadd.f32 %v568_v62, %v555_v61  ;;  %v582_v1 = vpop.f32.mrf.mxu3  ;;  %v623_v27 = vmul.f32 0.9800666, %v1010_v60  ;;  %v1012_v31 = vadd.f32 -0.039733864, %v1010_v60 }
  0xea   : > { %vm629_vm4 = vcmp.gt.f32.partialorder %v1010_v60, -0.9800666 }
  0xeb   : > { %v597_v2 = vsub.f32 1.0, %v595_v63  ;;  %v583_v3 = vadd.f32 %v582_v1, %v569_v0 }
  0xed   : > { %v590_v4 = vmul.f32 %v1127_v55, %v583_v3  ;;  %1128 = vrsqrt.f32 %v597_v2  ;;  %vm606_vm1 = vcmp.eq.f32.partialorder %v597_v2, inf  ;;  %v609_v21 = vand.u32 2147483648, %v597_v2 }
  0xee   : > { %vm608_vm2 = vcmp.eq.f32.partialorder %v597_v2, 0.0 }
  0xef   : > { %v1011_v5 = vclamps-f32 %v590_v4, 0.9999999  ;;  %v702_v4 = vld [vmem:[#allocation4] sm:$0xff] }
  0xf1   : > { %v596_v6 = vmul.f32 %v1011_v5, %v1011_v5  ;;  %v624_v40 = vmul.f32 0.9800666, %v1011_v5  ;;  %v1013_v45 = vadd.f32 -0.039733864, %v1011_v5  ;;  %vm630_vm8 = vcmp.gt.f32.partialorder %v1011_v5, -0.9800666 }
  0xf3   : > { %v1129_v7 = vpop.eup %1128  ;;  %v598_v8 = vsub.f32 1.0, %v596_v6 }
  0xf4   : > { %v600_v9 = vmul.f32 %v1129_v7, %v597_v2 }
  0xf5   : > { %1130 = vrsqrt.f32 %v598_v8  ;;  %vm618_vm5 = vcmp.eq.f32.partialorder %v598_v8, inf  ;;  %v621_v36 = vand.u32 2147483648, %v598_v8  ;;  %vm620_vm7 = vcmp.eq.f32.partialorder %v598_v8, 0.0 }
  0xf6   : > { %v601_v10 = vmul.f32 %v1129_v7, %v600_v9 }
  0xf8   : > { %v602_v11 = vmul.f32 0.5, %v601_v10  ;;  %v687_v10 = vld [vmem:[#allocation3] sm:$0xff] }
  0xfa   : > { %v603_v13 = vsub.f32 1.5, %v602_v11 }
  0xfb   : > { %v1131_v14 = vpop.eup %1130 }
  0xfc   : > { %v604_v15 = vmul.f32 %v1129_v7, %v603_v13  ;;  %v612_v17 = vmul.f32 %v1131_v14, %v598_v8 }
  0xfe   : > { %v605_v19 = vmul.f32 %v604_v15, %v597_v2  ;;  %v613_v20 = vmul.f32 %v1131_v14, %v612_v17 }
 0x100   : > { %v607_v22 = vsel %vm606_vm1, %v597_v2, %v605_v19  ;;  %v614_v24 = vmul.f32 0.5, %v613_v20  ;;  %v703_v20 = vld [vmem:[#allocation4 + $0x8] sm:$0xff] }
 0x101   : > { %v610_v26 = vsel %vm608_vm2, %v609_v21, %v607_v22 }
 0x102   : > { %v625_v28 = vmul.f32 0.19866933, %v610_v26  ;;  %v615_v29 = vsub.f32 1.5, %v614_v24 }
 0x104   : > { %v627_v30 = vsub.f32 %v623_v27, %v625_v28  ;;  %v616_v32 = vmul.f32 %v1131_v14, %v615_v29 }
 0x106   : > { %v633_v33 = vsel %vm629_vm4, %v627_v30, %v1012_v31  ;;  %v617_v34 = vmul.f32 %v616_v32, %v598_v8 }
 0x107   : > { %v650_v35 = vsel %vm648_vm3, %v633_v33, %v1010_v60 }
 0x108   : > { %v652_v37 = vmul.f32 30.0, %v650_v35  ;;  %v619_v38 = vsel %vm618_vm5, %v598_v8, %v617_v34 }
 0x109   : > { %v622_v39 = vsel %vm620_vm7, %v621_v36, %v619_v38 }
 0x10a   : > { %v626_v41 = vmul.f32 0.19866933, %v622_v39  ;;  %v655_v42 = vsel %vm654_vm6, %v652_v37, -1e+30 }
 0x10b   : > { %657 = vmax.xlane.f32.xlu1 %v655_v42  ;;  %v704_v58 = vsel %vm648_vm3, %v655_v42, 0.0 }
 0x10c   : > { %v628_v44 = vsub.f32 %v624_v40, %v626_v41 }
 0x10e   : > { %v634_v46 = vsel %vm630_vm8, %v628_v44, %v1013_v45 }
 0x10f   : > { %v651_v47 = vsel %vm649_vm9, %v634_v46, %v1011_v5 }
 0x110   : > { %v653_v48 = vmul.f32 30.0, %v651_v47 }
 0x112   : > { %v656_v49 = vsel %vm654_vm6, %v653_v48, -1e+30 }
 0x113   : > { %659 = vmax.xlane.f32.xlu1 %v656_v49  ;;  %v705_v3 = vsel %vm649_vm9, %v656_v49, 0.0 }
 0x17e   : > { %v658_v51 = vpop.xlane.xlu1 %657 }
 0x17f   : > { %v663_v52 = vmax.f32 %v661_v50, %v658_v51 }
 0x181   : > { %v665_v53 = vsub.f32 %v661_v50, %v663_v52  ;;  %700 = vst.msk [vmem:[#allocation2] sm:$0xff] %vm697_vm10, %v663_v52  ;;  %673 = vperm.xlu2 %1126, %v663_v52  }
 0x183   : > { %v667_v7 = vmul.f32 1.442695, %v665_v53 }
 0x186   : > { %v660_v55 = vpop.xlane.xlu1 %659 }
 0x187   : > { %v664_v56 = vmax.f32 %v662_v54, %v660_v55 }
 0x189   : > { %v666_v57 = vsub.f32 %v662_v54, %v664_v56  ;;  %701 = vst.msk [vmem:[#allocation2 + $0x8] sm:$0xff] %vm697_vm10, %v664_v56  ;;  %678 = vperm.xlu2 %1126, %v664_v56  }
 0x18b   : > { %v669_v8 = vmul.f32 1.442695, %v666_v57 }
 0x1b2   : > { %706 = vadd.xlane.f32.xlu2 %v704_v58 }
 0x1db   : > { %v674_v59 = vpop.permute.xlu2 %673 }
 0x1dc   : > { %v681_v60 = vsub.f32 %v655_v42, %v674_v59 }
 0x1de   : > { %v683_v61 = vmul.f32 1.442695, %v681_v60 }
 0x1e0   : > { %1132 = vpow2.f32 %v683_v61 }
 0x1e3   : > { %v679_v62 = vpop.permute.xlu2 %678 }
 0x1e4   : > { %v682_v63 = vsub.f32 %v656_v49, %v679_v62 }
 0x1e6   : > { %v1133_v0 = vpop.eup %1132  ;;  %v685_v1 = vmul.f32 1.442695, %v682_v63 }
 0x1e7   : > { %691 = vadd.xlane.f32.xlu0 %v1133_v0 }
 0x1e8   : > { %1134 = vpow2.f32 %v685_v1 }
 0x1e9   : > { %1136 = vpow2.f32 %v667_v7 }
 0x1ea   : > { %1138 = vpow2.f32 %v669_v8 }
 0x1ee   : > { %v1135_v2 = vpop.eup %1134 }
 0x1ef   : > { %693 = vadd.xlane.f32.xlu1 %v1135_v2  ;;  %v1137_v9 = vpop.eup %1136 }
 0x1f0   : > { %v689_v11 = vmul.f32 %v1137_v9, %v687_v10  ;;  %v1139_v15 = vpop.eup %1138 }
 0x1f1   : > { %v690_v17 = vmul.f32 %v1139_v15, %v688_v16 }
 0x1f7   : > { %708 = vadd.xlane.f32.xlu1 %v705_v3 }
 0x225   : > { %v707_v5 = vpop.xlane.xlu2 %706 }
 0x226   : > { %v710_v6 = vadd.f32 %v707_v5, %v702_v4 }
 0x228   : > { %712 = vst.msk [vmem:[#allocation4] sm:$0xff] %vm697_vm10, %v710_v6 }
 0x25a   : > { %v692_v13 = vpop.xlane.xlu0 %691 }
 0x25b   : > { %v695_v14 = vadd.f32 %v692_v13, %v689_v11 }
 0x25d   : > { %698 = vst.msk [vmem:[#allocation3] sm:$0xff] %vm697_vm10, %v695_v14 }
 0x262   : > { %v694_v18 = vpop.xlane.xlu1 %693 }
 0x263   : > { %v696_v19 = vadd.f32 %v694_v18, %v690_v17 }
 0x265   : > { %699 = vst.msk [vmem:[#allocation3 + $0x8] sm:$0xff] %vm697_vm10, %v696_v19 }
 0x269   : > { %717 = sbr.rel (%p1015_p1) target bundleno = 824 (0x338), region = 52 }
 0x26a   : > { %v709_v21 = vpop.xlane.xlu1 %708 }
 0x26b   : > { %v711_v22 = vadd.f32 %v709_v21, %v703_v20 }
 0x26d   : > { %713 = vst.msk [vmem:[#allocation4 + $0x8] sm:$0xff] %vm697_vm10, %v711_v22 }
 0x26e   : > { %v720_v23 = vld [vmem:[#allocation3] sm:$0xff]  ;;  %v721_v24 = vld [vmem:[#allocation3 + $0x8] sm:$0xff]  ;;  %v734_v25 = vshrl.u32 %v635_v12, 7  ;;  %v718_v27 = vld [vmem:[#allocation2] sm:$0xff]  ;;  %v736_v32 = vstv %s732_s7  ;;  %s1522_s7 = smov (!%p741_p4, %s732_s7), 1  ;;  %vm774_vm1 = vcmask 0  }
 0x26f   : > { %1140 = vlog2.f32 %v720_v23  ;;  %v719_v29 = vld [vmem:[#allocation2 + $0x8] sm:$0xff]  ;;  %v728_v34 = vld [vmem:[#allocation4] sm:$0xff]  ;;  %s743_s8 = scvt.s32.f32 %s1522_s7 }
 0x270   : > { %1142 = vlog2.f32 %v721_v24  ;;  %v735_v31 = vadd.s32 8, %v734_v25  ;;  %vm737_vm11 = vcmp.lt.s32.totalorder %v734_v25, %v736_v32 }
 0x271   : > { %v756_v44 = vstv %s743_s8 }
 0x272   : > { %vm738_vm12 = vcmp.lt.s32.totalorder %v735_v31, %v736_v32  ;;  %1144 = vrcp.f32 %v756_v44  ;;  %vm762_vm13 = vweird.f32 %v756_v44  ;;  %v768_v52 = vand.u32 2147483648, %v756_v44 }
 0x273   : > { %v766_v54 = vand.u32 2147483647, %v756_v44 }
 0x274   : > { %v729_v36 = vld [vmem:[#allocation4 + $0x8] sm:$0xff]  ;;  %v769_v57 = vor.u32 1.1754944e-38, %v768_v52 }
 0x275   : > { %v1141_v26 = vpop.eup %1140  ;;  %vm767_vm0 = vcmp.eq.f32.partialorder %v766_v54, 8.507059e+37 }
 0x276   : > { %v1143_v28 = vpop.eup %1142  ;;  %v723_v30 = vmul.f32 0.6931472, %v1141_v26 }
 0x277   : > { %v725_v33 = vmul.f32 0.6931472, %v1143_v28 }
 0x278   : > { %v726_v35 = vadd.f32 %v723_v30, %v718_v27  ;;  %v1145_v45 = vpop.eup %1144 }
 0x279   : > { %v727_v37 = vadd.f32 %v725_v33, %v719_v29  ;;  %v758_v46 = vmul.f32 %v1145_v45, %v756_v44  ;;  %vm763_vm14 = vweird.f32 %v1145_v45 }
 0x27a   : > { %v730_v38 = vsub.f32 %v726_v35, %v728_v34  ;;  %vm764_vm15 = vmor %vm762_vm13, %vm763_vm14 }
 0x27b   : > { %v731_v39 = vsub.f32 %v727_v37, %v729_v36  ;;  %v759_v47 = vsub.f32 1.0, %v758_v46 }
 0x27c   : > { %v739_v40 = vsel %vm737_vm11, %v730_v38, 0.0 }
 0x27d   : > { %v740_v41 = vsel %vm738_vm12, %v731_v39, 0.0  ;;  %v744_v12 = vsel %vm697_vm10, %v739_v40, 0.0  ;;  %v760_v49 = vmul.f32 %v1145_v45, %v759_v47 }
 0x27e   : > { %v745_v42 = vsel %vm697_vm10, %v740_v41, 0.0 }
 0x27f   : > { %v746_v43 = vadd.f32 %v745_v42, %v744_v12  ;;  %v761_v53 = vadd.f32 %v1145_v45, %v760_v49 }
 0x281   : > { %747 = vadd.xlane.f32.xlu0 %v746_v43  ;;  %v765_v58 = vsel %vm764_vm15, %v1145_v45, %v761_v53 }
 0x282   : > { %v770_v61 = vsel %vm767_vm0, %v769_v57, %v765_v58 }
 0x2f4   : > { %v748_v48 = vpop.xlane.xlu0 %747 }
 0x2f5   : > { %v749_v50 = vrot.slane %v748_v48, 4 }
 0x2f7   : > { %v750_v51 = vadd.f32 %v749_v50, %v748_v48 }
 0x2f9   : > { %v751_v55 = vrot.slane %v750_v51, 2 }
 0x2fb   : > { %v752_v56 = vadd.f32 %v751_v55, %v750_v51 }
 0x2fd   : > { %v753_v59 = vrot.slane %v752_v56, 1 }
 0x2ff   : > { %v754_v60 = vadd.f32 %v753_v59, %v752_v56 }
 0x301   : > { %1056 = vpush %v754_v60 }
 0x302   : > { %1058 = vpush %v770_v61 }
 0x332   : > { %s1057_s9 = spop %1056 }
 0x333   : > { %s1059_s10 = spop %1058 }
 0x334   : > { %s772_s12 = smul.f32 %s1059_s10, %s1057_s9 }
 0x336   : > { %v773_v62 = vstv %s772_s12 }
 0x337   : > { %775 = vst.msk [vmem:[#allocation12] sm:$0x1] %vm774_vm1, %v773_v62 }
 0x338 PF: > { %p1081_p5 = scmp.eq.s32.totalorder %s1340_s0, 2  ;;  %s1287_s13 = smov [#allocation12]  }
 0x339   : > { %s782_s14 = sshll.u32 %s1287_s13, 4  ;;  %s784_s17 = sshll.u32 %s1513_s5, 4  ;;  %s783_s14 = int_to_ptr.vmem [resolvable:$true] %s782_s14  ;;  %s785_s17 = int_to_ptr.hbm [resolvable:$true] %s784_s17 }
 0x33a   : > { %1067 = dma.vmem_to_hbm [thread:$0]  (%p1081_p5), %s783_s14, 16, %s785_s17, [#allocation9]  }
 0x33b   : > { %1259 = dma.done.wait (%p1081_p5), [#allocation9], 16  }
 0x33c   : > { %1261 = vsyncadd (%p1081_p5), [#allocation9], 4294967280 }
 0x33d PF: > { %p18_p13 = scmp.ge.s32.totalorder %s1365_s6, 5   ;;  %s1517_s20 = smov %s1268_s21 }
 0x33e   : > { %s1518_s21 = smov %s1272_s22  ;;  %s1519_s22 = smov %s1375_s11 }
 0x33f   : > { %s1520_s23 = smov %s1365_s6  ;;  %20 = sbr.rel (!%p18_p13) target bundleno = 7 (0x7), region = 89 }
 0x344   :  { %798 = vsyncpa [#allocation8], 1 }
 0x345   :  { %800 = vsyncpa [#allocation8 + $0x1], 1 }
 0x346   :  { %801 = vsyncpa [#allocation11], 1 }
 0x347   :  { %803 = vsyncpa [#allocation11 + $0x1], 1 }
 0x348   :  { %804 = vsyncpa [#allocation9], 1 }
 0x349   :  { %806 = vsyncpa [#allocation9 + $0x1], 1 }

</bundles_post_ra>
